<compile_context>
chip_gen: v7x
topology: tpu7x:2x2x1
jax: 0.10.0
libtpu: 0.0.40
codegen_flags: <defaults>
</compile_context>

<pallas_src>
import math

import jax
import jax.numpy as jnp
from jax.experimental import pallas as pl
from jax.experimental.pallas import tpu as pltpu


def _round_up(x, m):
    return ((x + m - 1) // m) * m


def actor_critic_kernel(x_ref, w1_ref, b1_ref, w2_ref, b2_ref, out_ref):
    """One fused forward step for a [TB, D] batch tile.

    x_ref  : [TB, D]      input states
    w1_ref : [D, 2H]      concat(W_pi1, W_v1)          (layer-1 fusion)
    b1_ref : [1, 2H]      concat(b_pi1, b_v1)
    w2_ref : [2H, Npad]   blockdiag(W_pi, W_v), lane-padded with zeros to 128
    b2_ref : [1, Npad]    concat(b_pi, b_v), lane-padded with zeros
    out_ref: [TB, Npad]   concat(pi, v, zeros) along lanes (lane-dense store)
    """
    x = x_ref[...]
    w1 = w1_ref[...]
    # Match MXU input dtype to the stored layer-1 weight dtype (bf16 path on
    # v6e/v5e); accumulation stays f32.
    h = jnp.dot(x.astype(w1.dtype), w1, preferred_element_type=jnp.float32)
    # Bias add + ReLU in f32 on the VPU (v5e has no bf16 VPU path).
    h = jnp.maximum(h + b1_ref[...].astype(jnp.float32), 0.0)

    # Layer-2 weights are kept f32, so no f32->bf16 convert of the [TB, 2H]
    # hidden activation is needed; this GEMM (K=2H, N=128) is tiny on the MXU.
    out = jnp.dot(h, w2_ref[...], preferred_element_type=jnp.float32)
    out_ref[...] = (out + b2_ref[...]).astype(out_ref.dtype)


def actor_critic_forward(state, params, n_actions, *, block_batch=2048):
    """state: [B, D] float32.  Returns (pi [B, n_actions], v [B, 1])."""
    B, D = state.shape
    w1, b1 = params["w1cat"], params["b1cat"]
    w2, b2 = params["w2cat"], params["b2cat"]
    h2 = w1.shape[1]                 # 2 * hidden (= 256)
    n_pad = w2.shape[1]              # n_actions + 1 padded to 128 lanes
    n_out = n_actions + 1

    # Batch tile: multiple of 8 sublanes, capped at block_batch, and capped at
    # ceil(B/2) so v7x's two TensorCores both get grid steps at large B.
    TB = max(8, min(block_batch, _round_up(pl.cdiv(B, 2), 8)))
    Bp = _round_up(B, TB)
    if Bp != B:
        state = jnp.pad(state, ((0, Bp - B), (0, 0)))

    out = pl.pallas_call(
        actor_critic_kernel,
        out_shape=jax.ShapeDtypeStruct((Bp, n_pad), jnp.float32),
        grid=(Bp // TB,),
        in_specs=[
            pl.BlockSpec((TB, D), lambda i: (i, 0)),       # x tile (pipelined)
            pl.BlockSpec((D, h2), lambda i: (0, 0)),       # fused W1 (resident)
            pl.BlockSpec((1, h2), lambda i: (0, 0)),       # fused b1 (resident)
            pl.BlockSpec((h2, n_pad), lambda i: (0, 0)),   # fused W2 (resident)
            pl.BlockSpec((1, n_pad), lambda i: (0, 0)),    # fused b2 (resident)
        ],
        out_specs=pl.BlockSpec((TB, n_pad), lambda i: (i, 0)),
        compiler_params=pltpu.CompilerParams(
            dimension_semantics=("parallel",),
            vmem_limit_bytes=32 * 1024 * 1024),
    )(state, w1, b1, w2, b2)

    pi = out[:B, :n_actions]
    v = out[:B, n_actions:n_out]
    return pi, v


def init_params(key, input_dims, n_actions, hidden=128, param_dtype=jnp.float32):
    """Init mimicking nn.Linear's U(-1/sqrt(fan_in), 1/sqrt(fan_in)).

    Per-layer weights are kept (f32, [in, out] layout) for the reference
    check; the kernel consumes the fused / lane-padded versions.
    param_dtype only affects w1cat (bf16 storage option for v6e/v5e); the
    tiny layer-2 weights and all biases stay f32.  Note: with bf16 weights
    the 1e-5 allclose vs. the f32 reference would loosen.
    """
    keys = jax.random.split(key, 8)

    def linear(kw, kb, fan_in, fan_out):
        bound = 1.0 / math.sqrt(fan_in)
        w = jax.random.uniform(kw, (fan_in, fan_out), jnp.float32,
                               minval=-bound, maxval=bound)
        b = jax.random.uniform(kb, (1, fan_out), jnp.float32,
                               minval=-bound, maxval=bound)
        return w, b

    w_pi1, b_pi1 = linear(keys[0], keys[1], input_dims, hidden)
    w_v1, b_v1 = linear(keys[2], keys[3], input_dims, hidden)
    w_pi, b_pi = linear(keys[4], keys[5], hidden, n_actions)
    w_v, b_v = linear(keys[6], keys[7], hidden, 1)

    # Layer-1 fusion: one [D, 2H] weight, one [1, 2H] bias.
    w1cat = jnp.concatenate([w_pi1, w_v1], axis=1)
    b1cat = jnp.concatenate([b_pi1, b_v1], axis=1)

    # Layer-2 fusion: block-diagonal on a lane-padded [2H, 128k] slab.
    # Zero columns / zero off-diagonal blocks contribute exactly 0 under f32
    # accumulation, so the math is identical to the unfused layers.
    n_pad = _round_up(n_actions + 1, 128)
    w2cat = jnp.zeros((2 * hidden, n_pad), jnp.float32)
    w2cat = w2cat.at[:hidden, :n_actions].set(w_pi)
    w2cat = w2cat.at[hidden:, n_actions:n_actions + 1].set(w_v)
    b2cat = jnp.zeros((1, n_pad), jnp.float32)
    b2cat = b2cat.at[:, :n_actions].set(b_pi[0])
    b2cat = b2cat.at[:, n_actions:n_actions + 1].set(b_v[0])

    return dict(
        # fused params consumed by the kernel
        w1cat=w1cat.astype(param_dtype), b1cat=b1cat,
        w2cat=w2cat, b2cat=b2cat,
        # original per-layer params (f32) for the reference check
        w_pi1=w_pi1, b_pi1=b_pi1, w_v1=w_v1, b_v1=b_v1,
        w_pi=w_pi, b_pi=b_pi, w_v=w_v, b_v=b_v,
    )


def reference_forward(state, p):
    """Pure-JAX mirror of the PyTorch ActorCritic.forward (unfused weights)."""
    h_pi = jax.nn.relu(state @ p["w_pi1"] + p["b_pi1"])
    h_v = jax.nn.relu(state @ p["w_v1"] + p["b_v1"])
    return h_pi @ p["w_pi"] + p["b_pi"], h_v @ p["w_v"] + p["b_v"]


# TODO(synk): remember/calc_R/calc_loss/choose_action are host-side A3C
# bookkeeping (lists, Categorical sampling, discounted-return loop) and are
# intentionally not kernels; only forward() is implemented on TPU.

if __name__ == "__main__":
    key = jax.random.PRNGKey(0)
    k_params, k_state = jax.random.split(key)

    batch = 8
    input_dims = 4      # e.g. CartPole observation size
    n_actions = 2
    hidden = 128

    params = init_params(k_params, input_dims, n_actions, hidden)
    state = jax.random.normal(k_state, (batch, input_dims), jnp.float32)

    pi, v = actor_critic_forward(state, params, n_actions)
    jax.block_until_ready((pi, v))

    pi_ref, v_ref = reference_forward(state, params)
    assert pi.shape == (batch, n_actions)
    assert v.shape == (batch, 1)
    assert jnp.allclose(pi, pi_ref, atol=1e-5, rtol=1e-5)
    assert jnp.allclose(v, v_ref, atol=1e-5, rtol=1e-5)

    print("KERNEL_OK")
</pallas_src>

<mosaic_0001>
module attributes {stable_mosaic.version = 11 : i64} {
  func.func @actor_critic_kernel(%arg0: i32, %arg1: memref<8x4xf32, #tpu.memory_space<vmem>>, %arg2: memref<4x256xf32, #tpu.memory_space<vmem>>, %arg3: memref<1x256xf32, #tpu.memory_space<vmem>>, %arg4: memref<256x128xf32, #tpu.memory_space<vmem>>, %arg5: memref<1x128xf32, #tpu.memory_space<vmem>>, %arg6: memref<8x128xf32, #tpu.memory_space<vmem>>) attributes {dimension_semantics = [#tpu.dimension_semantics<parallel>], iteration_bounds = array<i64: 1>, scalar_prefetch = 0 : i64, scratch_operands = 0 : i64, tpu.core_type = #tpu.core_type<tc>, window_params = [{transform_indices = @transform_0, window_bounds = array<i64: 8, 4>}, {pipeline_mode = #tpu.pipeline_mode<synchronous>, transform_indices = @transform_1, window_bounds = array<i64: 4, 256>}, {pipeline_mode = #tpu.pipeline_mode<synchronous>, transform_indices = @transform_2, window_bounds = array<i64: 1, 256>}, {pipeline_mode = #tpu.pipeline_mode<synchronous>, transform_indices = @transform_3, window_bounds = array<i64: 256, 128>}, {pipeline_mode = #tpu.pipeline_mode<synchronous>, transform_indices = @transform_4, window_bounds = array<i64: 1, 128>}, {transform_indices = @transform_5, window_bounds = array<i64: 8, 128>}]} {
    %c0 = arith.constant 0 : index
    %c0_0 = arith.constant 0 : index
    %0 = vector.load %arg1[%c0, %c0_0] : memref<8x4xf32, #tpu.memory_space<vmem>>, vector<8x4xf32>
    %c0_1 = arith.constant 0 : index
    %c0_2 = arith.constant 0 : index
    %1 = vector.load %arg2[%c0_1, %c0_2] : memref<4x256xf32, #tpu.memory_space<vmem>>, vector<4x256xf32>
    %cst = arith.constant dense<0.000000e+00> : vector<8x256xf32>
    %2 = tpu.matmul %0, %1, %cst {dimension_numbers = #tpu.dot_dimension_numbers<[1], [0], [0], [1], [0, 0, 1, 1], [], []>} : vector<8x4xf32>, vector<4x256xf32>, vector<8x256xf32> -> vector<8x256xf32>
    %c0_3 = arith.constant 0 : index
    %c0_4 = arith.constant 0 : index
    %3 = vector.load %arg3[%c0_3, %c0_4] : memref<1x256xf32, #tpu.memory_space<vmem>>, vector<1x256xf32>
    %4 = vector.broadcast %3 : vector<1x256xf32> to vector<8x256xf32>
    %5 = arith.addf %2, %4 : vector<8x256xf32>
    %cst_5 = arith.constant 0.000000e+00 : f32
    %6 = vector.broadcast %cst_5 : f32 to vector<8x256xf32>
    %7 = arith.maximumf %5, %6 : vector<8x256xf32>
    %c0_6 = arith.constant 0 : index
    %c0_7 = arith.constant 0 : index
    %8 = vector.load %arg4[%c0_6, %c0_7] : memref<256x128xf32, #tpu.memory_space<vmem>>, vector<256x128xf32>
    %cst_8 = arith.constant dense<0.000000e+00> : vector<8x128xf32>
    %9 = tpu.matmul %7, %8, %cst_8 {dimension_numbers = #tpu.dot_dimension_numbers<[1], [0], [0], [1], [0, 0, 1, 1], [], []>} : vector<8x256xf32>, vector<256x128xf32>, vector<8x128xf32> -> vector<8x128xf32>
    %c0_9 = arith.constant 0 : index
    %c0_10 = arith.constant 0 : index
    %10 = vector.load %arg5[%c0_9, %c0_10] : memref<1x128xf32, #tpu.memory_space<vmem>>, vector<1x128xf32>
    %11 = vector.broadcast %10 : vector<1x128xf32> to vector<8x128xf32>
    %12 = arith.addf %9, %11 : vector<8x128xf32>
    %c0_11 = arith.constant 0 : index
    %c0_12 = arith.constant 0 : index
    %13 = vector.load %arg6[%c0_11, %c0_12] : memref<8x128xf32, #tpu.memory_space<vmem>>, vector<8x128xf32>
    tpu.vector_store %arg6[%c0_11, %c0_12], %12 {strides = array<i32>} : memref<8x128xf32, #tpu.memory_space<vmem>>, vector<8x128xf32>,
    return
  }
  func.func @transform_0(%arg0: i32) -> (i32, i32) {
    %c0_i32 = arith.constant 0 : i32
    %c0_i32_0 = arith.constant 0 : i32
    return %arg0, %c0_i32 : i32, i32
  }
  func.func @transform_1(%arg0: i32) -> (i32, i32) {
    %c0_i32 = arith.constant 0 : i32
    %c0_i32_0 = arith.constant 0 : i32
    %c0_i32_1 = arith.constant 0 : i32
    return %c0_i32, %c0_i32_0 : i32, i32
  }
  func.func @transform_2(%arg0: i32) -> (i32, i32) {
    %c0_i32 = arith.constant 0 : i32
    %c0_i32_0 = arith.constant 0 : i32
    %c0_i32_1 = arith.constant 0 : i32
    return %c0_i32, %c0_i32_0 : i32, i32
  }
  func.func @transform_3(%arg0: i32) -> (i32, i32) {
    %c0_i32 = arith.constant 0 : i32
    %c0_i32_0 = arith.constant 0 : i32
    %c0_i32_1 = arith.constant 0 : i32
    return %c0_i32, %c0_i32_0 : i32, i32
  }
  func.func @transform_4(%arg0: i32) -> (i32, i32) {
    %c0_i32 = arith.constant 0 : i32
    %c0_i32_0 = arith.constant 0 : i32
    %c0_i32_1 = arith.constant 0 : i32
    return %c0_i32, %c0_i32_0 : i32, i32
  }
  func.func @transform_5(%arg0: i32) -> (i32, i32) {
    %c0_i32 = arith.constant 0 : i32
    %c0_i32_0 = arith.constant 0 : i32
    return %arg0, %c0_i32 : i32, i32
  }
}

</mosaic_0001>

<bundles_post_ra>
// kernel: tpu_custom_call.1
= control target key start
LH: loop header
LB: loop body
LE: loop exit
PB: predicated region body
PF: predicated region fallthrough
CT: control target
= control target key end

     0   :  { %10 = vsyncpa [#allocation3], 0  ;;  %s456_s0 = inlined_call_operand.vmem [shape: f32[8,4], index: 0, kind: input, shape index: {}]   ;;  %s457_s1 = inlined_call_operand.vmem [shape: f32[4,256], index: 1, kind: input, shape index: {}]   ;;  %s458_s2 = inlined_call_operand.vmem [shape: f32[1,256], index: 2, kind: input, shape index: {}]   ;;  %s459_s3 = inlined_call_operand.hbm [shape: f32[256,128], index: 3, kind: input, shape index: {}]   ;;  %s460_s4 = inlined_call_operand.vmem [shape: f32[1,128], index: 4, kind: input, shape index: {}]   ;;  %s461_s5 = inlined_call_operand.hbm [shape: f32[8,128], index: 5, kind: output, shape index: {}]  }
   0x1   :  { %11 = vsyncpa [#allocation4], 0  ;;  %s383_s18 = smov [#allocation2]   ;;  %s335_s22 = scalar_lea.hbm %s459_s3, 4096 }
   0x2   :  { %s23_s19 = sshll.u32 %s383_s18, 4  ;;  %p336_p0 = scmp.ne.s32.totalorder %s459_s3, %s335_s22  ;;  %s24_s19 = int_to_ptr.vmem [resolvable:$true] %s23_s19 }
   0x3   :  { %p339_p1 = scmp.lt.u32.totalorder %s335_s22, %s459_s3 }
   0x5   :  { %p341_p2 = pnand %p339_p1, %p336_p0 }
   0x7   :  { %344 = shalt.err (!%p341_p2)
}
   0x8   :  { %s345_s27 = scalar_lea.vmem %s24_s19, 4096  ;;  %p350_p4 = scmp.lt.s32.totalorder %s24_s19, %s24_s19 }
   0x9   :  { %p346_p3 = scmp.ne.s32.totalorder %s24_s19, %s345_s27  ;;  %p351_p5 = scmp.lt.s32.totalorder %s345_s27, %s345_s27 }
   0xb   :  { %p352_p6 = por %p351_p5, %p350_p4 }
   0xd   :  { %p353_p7 = pnand %p352_p6, %p346_p3 }
   0xf   :  { %356 = shalt.err (!%p353_p7)
}
  0x10   :  { %s384_s28 = smov 128   ;;  %s385_s29 = smov 8  }
  0x11   :  { %29 = dma.hbm_to_vmem [thread:$0]  %s459_s3, 4096, %s24_s19, [#allocation3], %s384_s28, %s384_s28, %s385_s29  }
  0x12   :  { %379 = dma.done.wait [#allocation3], 4096  }
  0x13   :  { %380 = vsyncadd [#allocation3], 4294963200  ;;  %v386_v0 = vmov 0.0   ;;  %v36_v1 = vld [vmem:[%s457_s1] sm:$0xff]  ;;  %vm55_vm0 = vcmask 1043456   ;;  %v149_v3 = vld [vmem:[#allocation2 + $0x80] sm:$0xff]  ;;  %v39_v52 = vlaneseq }
  0x14   :  { %124 = vmatprep.mubr.f32.mxu0 %v386_v0  ;;  %v35_v2 = vld [vmem:[%s456_s0] sm:$0xff]  ;;  %v50_v4 = vcombine.high %v36_v1, %v36_v1  ;;  %v150_v5 = vld [vmem:[#allocation2 + $0x88] sm:$0xff]  ;;  %v133_v6 = vld [vmem:[#allocation2] sm:$0xff]  ;;  %vm51_vm1 = vcmask 31744   ;;  %s387_s12 = smov [#allocation5]  }
  0x15   :  { %v134_v7 = vld [vmem:[#allocation2 + $0x8] sm:$0xff]  ;;  %v297_v8 = vpack.c.bf16 %v150_v5, %v149_v3  ;;  %v151_v10 = vld [vmem:[#allocation2 + $0x90] sm:$0xff]  ;;  %v152_v11 = vld [vmem:[#allocation2 + $0x98] sm:$0xff]  ;;  %v40_v53 = vshrl.u32 %v39_v52, 7  ;;  %s249_s13 = sshll.u32 %s387_s12, 4  ;;  %s250_s13 = int_to_ptr.vmem [resolvable:$true] %s249_s13 }
  0x16   :  { %v299_v9 = vpack.c.bf16 %v134_v7, %v133_v6  ;;  %v135_v12 = vld [vmem:[#allocation2 + $0x10] sm:$0xff]  ;;  %258 = vmatprep.subr.msk.mxu0 %vm55_vm0, %v50_v4  ;;  %v301_v13 = vpack.c.bf16 %v152_v11, %v151_v10  ;;  %v136_v14 = vld [vmem:[#allocation2 + $0x18] sm:$0xff]  ;;  %v153_v15 = vld [vmem:[#allocation2 + $0xa0] sm:$0xff]  ;;  %p362_p9 = scmp.lt.s32.totalorder %s250_s13, %s250_s13 }
  0x17   :  { %v154_v16 = vld [vmem:[#allocation2 + $0xa8] sm:$0xff]  ;;  %259 = vmatpush1.msk.msra.mxu0 %vm55_vm0, %v36_v1  ;;  %298 = vmatprep.subr.bf16.mxu1 %v297_v8  ;;  %v303_v17 = vpack.c.bf16 %v136_v14, %v135_v12  ;;  %v137_v19 = vld [vmem:[#allocation2 + $0x20] sm:$0xff]  ;;  %v155_v21 = vld [vmem:[#allocation2 + $0xb0] sm:$0xff]  ;;  %v41_v54 = vsub.s32 0, %v40_v53  ;;  %v45_v56 = vsub.s32 1, %v40_v53 }
  0x18   :  { %260 = vmatmul.mubr.msk.f32.vlgmr.msra.gmra.mrb[0].mxu0 %vm51_vm1, %v35_v2  ;;  %300 = vmatpush3.bf16.msra.mxu1 %v299_v9  ;;  %v305_v18 = vpack.c.bf16 %v154_v16, %v153_v15  ;;  %v138_v20 = vld [vmem:[#allocation2 + $0x28] sm:$0xff]  ;;  %v156_v22 = vld [vmem:[#allocation2 + $0xb8] sm:$0xff]  ;;  %v139_v25 = vld [vmem:[#allocation2 + $0x30] sm:$0xff] }
  0x19   :  { %302 = vmatprep.subr.bf16.mxu1 %v301_v13  ;;  %v307_v23 = vpack.c.bf16 %v138_v20, %v137_v19  ;;  %v309_v24 = vpack.c.bf16 %v156_v22, %v155_v21  ;;  %v140_v26 = vld [vmem:[#allocation2 + $0x38] sm:$0xff]  ;;  %v157_v27 = vld [vmem:[#allocation2 + $0xc0] sm:$0xff]  ;;  %v158_v28 = vld [vmem:[#allocation2 + $0xc8] sm:$0xff] }
  0x1a   :  { %v311_v29 = vpack.c.bf16 %v140_v26, %v139_v25  ;;  %v313_v30 = vpack.c.bf16 %v158_v28, %v157_v27  ;;  %v141_v31 = vld [vmem:[#allocation2 + $0x40] sm:$0xff]  ;;  %v142_v32 = vld [vmem:[#allocation2 + $0x48] sm:$0xff]  ;;  %v159_v33 = vld [vmem:[#allocation2 + $0xd0] sm:$0xff] }
  0x1b   :  { %v160_v34 = vld [vmem:[#allocation2 + $0xd8] sm:$0xff]  ;;  %v315_v35 = vpack.c.bf16 %v142_v32, %v141_v31  ;;  %v143_v37 = vld [vmem:[#allocation2 + $0x50] sm:$0xff]  ;;  %v161_v39 = vld [vmem:[#allocation2 + $0xe0] sm:$0xff] }
  0x1c   :  { %304 = vmatpush3.bf16.msra.mxu1 %v303_v17  ;;  %v317_v36 = vpack.c.bf16 %v160_v34, %v159_v33  ;;  %v144_v38 = vld [vmem:[#allocation2 + $0x58] sm:$0xff]  ;;  %v162_v40 = vld [vmem:[#allocation2 + $0xe8] sm:$0xff]  ;;  %v145_v43 = vld [vmem:[#allocation2 + $0x60] sm:$0xff] }
  0x1d   :  { %306 = vmatprep.subr.bf16.mxu1 %v305_v18  ;;  %v319_v41 = vpack.c.bf16 %v144_v38, %v143_v37  ;;  %v321_v42 = vpack.c.bf16 %v162_v40, %v161_v39  ;;  %v146_v44 = vld [vmem:[#allocation2 + $0x68] sm:$0xff]  ;;  %v163_v46 = vld [vmem:[#allocation2 + $0xf0] sm:$0xff]  ;;  %v164_v47 = vld [vmem:[#allocation2 + $0xf8] sm:$0xff] }
  0x1e   :  { %v323_v45 = vpack.c.bf16 %v146_v44, %v145_v43  ;;  %v325_v48 = vpack.c.bf16 %v164_v47, %v163_v46  ;;  %v147_v49 = vld [vmem:[#allocation2 + $0x70] sm:$0xff]  ;;  %v148_v50 = vld [vmem:[#allocation2 + $0x78] sm:$0xff] }
  0x1f   :  { %v327_v51 = vpack.c.bf16 %v148_v50, %v147_v49  ;;  %v37_v55 = vld [vmem:[%s458_s2] sm:$0x3]  ;;  %s357_s2 = scalar_lea.vmem %s250_s13, 128 }
  0x20   :  { %308 = vmatpush3.bf16.msra.mxu1 %v307_v23  ;;  %v42_v57 = vrot.slane %v37_v55, %v41_v54  ;;  %v46_v58 = vrot.slane %v37_v55, %v45_v56  ;;  %v261_v2 = vld [vmem:[%s460_s4] ss:$0 sm:$0xff]  ;;  %p358_p8 = scmp.ne.s32.totalorder %s250_s13, %s357_s2  ;;  %p363_p10 = scmp.lt.s32.totalorder %s357_s2, %s357_s2 }
  0x21   :  { %310 = vmatprep.subr.bf16.mxu1 %v309_v24 }
  0x22   :  { %p364_p11 = por %p363_p10, %p362_p9 }
  0x24   :  { %312 = vmatpush3.bf16.msra.mxu1 %v311_v29  ;;  %p365_p12 = pnand %p364_p11, %p358_p8 }
  0x25   :  { %314 = vmatprep.subr.bf16.mxu1 %v313_v30 }
  0x28   :  { %316 = vmatpush3.bf16.msra.mxu1 %v315_v35 }
  0x29   :  { %318 = vmatprep.subr.bf16.mxu1 %v317_v36 }
  0x2c   :  { %320 = vmatpush3.bf16.msra.mxu1 %v319_v41 }
  0x2d   :  { %322 = vmatprep.subr.bf16.mxu1 %v321_v42 }
  0x30   :  { %324 = vmatpush3.bf16.msra.mxu1 %v323_v45 }
  0x31   :  { %326 = vmatprep.subr.bf16.mxu1 %v325_v48 }
  0x34   :  { %328 = vmatpush3.bf16.msra.mxu1 %v327_v51 }
  0xeb   :  { %v126_v59 = vpop.f32.mrb[0].mxu0 }
  0xec   :  { %v127_v60 = vadd.f32 %v126_v59, %v42_v57  ;;  %v128_v61 = vpop.f32.mrb[1].mxu0 }
  0xed   :  { %v129_v62 = vadd.f32 %v128_v61, %v46_v58 }
  0xee   :  { %v131_v0 = vmax.f32 %v127_v60, 0.0 }
  0xef   :  { %v132_v63 = vmax.f32 %v129_v62, 0.0 }
  0xf1   :  { %236 = vmatprep.mubr.f32.mxu1 %v132_v63 }
  0xf2   :  { %237 = vmatmul.mubr.f32.vlgmr.msra.gmra.mrb[0].mxu1 %v131_v0 }
 0x1c5   :  { %v294_v1 = vpop.f32.mrb[0].mxu1 }
 0x1c6   :  { %v295_v3 = vpop.f32.mrb[1].mxu1 }
 0x1c7   :  { %v296_v4 = vadd.f32 %v295_v3, %v294_v1 }
 0x1c9   :  { %v239_v5 = vadd.f32 %v296_v4, %v261_v2 }
 0x1cb   :  { %242 = vst [vmem:[#allocation5] sm:$0xff] %v239_v5 }
 0x1cc   :  { %368 = shalt.err (!%p365_p12)
}
 0x1cd   :  { %s369_s16 = scalar_lea.hbm %s461_s5, 128 }
 0x1ce   :  { %p370_p13 = scmp.ne.s32.totalorder %s461_s5, %s369_s16  ;;  %p373_p0 = scmp.lt.u32.totalorder %s369_s16, %s461_s5 }
 0x1d0   :  { %p375_p1 = pnand %p373_p0, %p370_p13 }
 0x1d2   :  { %378 = shalt.err (!%p375_p1)
}
 0x1d3   :  { %252 = dma.vmem_to_hbm [thread:$0]  %s250_s13, 128, %s461_s5, [#allocation4]  }
 0x1d4   :  { %381 = dma.done.wait [#allocation4], 128  }
 0x1d5   :  { %382 = vsyncadd [#allocation4], 4294967168 }
 0x1d6   :  { %256 = vsyncpa [#allocation3], 1 }
 0x1d7   :  { %257 = vsyncpa [#allocation4], 1 }

</bundles_post_ra>
